<compile_context>
chip_gen: v7x
topology: tpu7x:2x2x1
jax: 0.10.0
libtpu: 0.0.40
codegen_flags: <defaults>
</compile_context>

<pallas_src>
import functools

import jax
import jax.numpy as jnp
from jax.experimental import pallas as pl
from jax.experimental.pallas import tpu as pltpu

_LANES = 128
_MAX_ROWS = 4096     # rows per block: f32 tile = 2 MiB (sweep 2048-8192 if tuning)
_ACC_ROWS = 8        # vreg-shaped accumulator (8, 128)


def _round_down(x, m):
    return (x // m) * m


def _num_parallel_cores():
    """Best-effort TensorCore count for the leading 'parallel' grid axis.

    v5e / v6e expose a single TensorCore per chip, so a 2-way grid split only
    adds (a little) redundant work there; v4 (megacore) and v7x have two
    TensorCores that dimension_semantics=("parallel", ...) can shard across.
    """
    try:
        kind = jax.devices()[0].device_kind.lower()
    except Exception:   # no devices / exotic backend -> safe default
        return 1
    return 2 if any(t in kind for t in ("v7", "7x", "v4")) else 1


def _focal_kernel(x_ref, y_ref, out_ref, *, alpha, gamma, binary_labels,
                  orig_n, row_blk, ni, nb_full, needs_mask):
    c = pl.program_id(0)           # (possibly) core-parallel axis
    i = pl.program_id(1)           # reduction axis (output resident across it)

    @pl.when(i == 0)
    def _():
        out_ref[...] = jnp.zeros_like(out_ref)

    x = x_ref[...].astype(jnp.float32)   # logits tile
    y_raw = y_ref[...]                   # labels tile, native dtype

    def loss_fn(x, y_raw):
        # One exp(-|x|) feeds both sigmoid and the stable BCE-with-logits.
        e = jnp.exp(-jnp.abs(x))
        one_p_e = 1.0 + e
        inv = pl.reciprocal(one_p_e, approx=True)          # EUP, own slot
        probs = jnp.where(x >= 0.0, inv, e * inv)           # sigmoid(x)
        log_term = jnp.log(one_p_e)
        if binary_labels:
            # Hard 0/1 labels: selects instead of mul-blends (fewer VALU ops).
            yb = y_raw != 0
            ce = jnp.maximum(x, 0.0) - jnp.where(yb, x, 0.0) + log_term
            p_t = jnp.where(yb, probs, 1.0 - probs)
            alpha_t = jnp.where(yb, jnp.float32(alpha), jnp.float32(1.0 - alpha))
        else:
            # Soft (float) labels: keep the exact BCEWithLogits blend form.
            y = y_raw.astype(jnp.float32)
            ce = jnp.maximum(x, 0.0) - x * y + log_term
            p_t = probs * y + (1.0 - probs) * (1.0 - y)
            alpha_t = alpha * y + (1.0 - alpha) * (1.0 - y)

        one_m_pt = 1.0 - p_t
        g = float(gamma)
        if g == round(g) and 0 <= int(round(g)) <= 8:
            # Integer gamma (the default 2): VPU multiplies, no pow/EUP.
            n = int(round(g))
            mod = jnp.ones_like(one_m_pt) if n == 0 else one_m_pt
            for _ in range(max(n - 1, 0)):
                mod = mod * one_m_pt
        else:
            mod = one_m_pt ** g
        return alpha_t * mod * ce

    def accum(vals):
        # Fold the (row_blk, 128) tile into the vreg-shaped accumulator with
        # elementwise adds; the cross-lane reduce is deferred to the wrapper.
        out_ref[...] += vals.reshape(-1, _ACC_ROWS, _LANES).sum(axis=0)

    if not needs_mask:
        accum(loss_fn(x, y_raw))
    else:
        tile = row_blk * _LANES
        gblk = c * ni + i              # global block index

        @pl.when(gblk < nb_full)
        def _():                       # fully-valid block: no masking cost
            accum(loss_fn(x, y_raw))

        @pl.when(gblk >= nb_full)
        def _():
            # Ragged last block / clamped phantom block: mask invalid elements.
            # `valid` may be <= 0 (fully masked).  int32 math is guarded by the
            # orig_n < 2**31 assert in the wrapper.
            valid = orig_n - gblk * tile
            row = jax.lax.broadcasted_iota(jnp.int32, (row_blk, _LANES), 0)
            lane = jax.lax.broadcasted_iota(jnp.int32, (row_blk, _LANES), 1)
            m = (row * _LANES + lane) < valid
            # Mask x (and soft y) BEFORE exp/log: OOB VMEM content is undefined.
            xs = jnp.where(m, x, 0.0)
            ys = y_raw if binary_labels else jnp.where(m, y_raw, jnp.zeros_like(y_raw))
            accum(jnp.where(m, loss_fn(xs, ys), 0.0))


def _focal_loss_ref(logits, label, alpha=0.25, gamma=2.0, reduction="mean"):
    """Pure-jnp reference (also the fallback for tiny inputs)."""
    x = logits.astype(jnp.float32)
    y = label.astype(jnp.float32)
    probs = jax.nn.sigmoid(x)
    p_t = probs * y + (1 - probs) * (1 - y)
    ce = jnp.maximum(x, 0.0) - x * y + jnp.log1p(jnp.exp(-jnp.abs(x)))
    alpha_t = alpha * y + (1 - alpha) * (1 - y)
    loss = alpha_t * (1 - p_t) ** gamma * ce
    return jnp.mean(loss) if reduction == "mean" else jnp.sum(loss)


def focal_loss_v1(logits, label, alpha=0.25, gamma=2.0, reduction="mean"):
    """Pallas TPU implementation of FocalLossV1.forward (reduction: mean/sum)."""
    assert logits.shape == label.shape
    orig_n = int(logits.size)
    assert 0 < orig_n < 2 ** 31, "kernel index math is int32"

    if reduction == "mean":
        scale = 1.0 / float(orig_n)
    elif reduction == "sum":
        scale = 1.0
    else:
        # TODO(synk): reduction='none' (full elementwise loss output) not implemented.
        raise NotImplementedError("only 'mean' and 'sum' reductions are supported")

    # Keep native dtypes on the HBM side; the f32 upcast happens in the kernel.
    x = logits.reshape(-1)
    if not (x.dtype == jnp.float32 or x.dtype == jnp.bfloat16):
        x = x.astype(jnp.float32)
    y = label.reshape(-1)
    binary_labels = not jnp.issubdtype(y.dtype, jnp.floating)
    if binary_labels:
        if y.dtype.itemsize > 4:                 # e.g. int64 labels (x64 mode)
            y = y.astype(jnp.int32)
    elif not (y.dtype == jnp.float32 or y.dtype == jnp.bfloat16):
        y = y.astype(jnp.float32)                # soft labels

    # Sublane alignment for the narrowest dtype travelling to VMEM
    # (8 rows for 4-byte, 16 for 2-byte, 32 for 1-byte elements).
    align = max(_ACC_ROWS, 32 // min(x.dtype.itemsize, y.dtype.itemsize))

    rows = -(-orig_n // _LANES)
    if rows < align:
        # Tiny input (< align*128 elements): a kernel launch is not worth it.
        return _focal_loss_ref(logits, label, alpha, gamma, reduction)

    pad = rows * _LANES - orig_n
    if pad:
        # Rare: total size not a multiple of 128 lanes (< 128 pad elements, but
        # jnp.pad copies the whole array).  The common lane-aligned case below
        # is a pure reshape: zero extra HBM traffic; block-level raggedness is
        # handled by the in-kernel mask instead of padding.
        x = jnp.pad(x, (0, pad))
        y = jnp.pad(y, (0, pad))
    x2 = x.reshape(rows, _LANES)
    y2 = y.reshape(rows, _LANES)

    row_blk = min(_MAX_ROWS, _round_down(rows, align))
    tile = row_blk * _LANES
    nb = -(-rows // row_blk)                      # blocks holding real rows
    nc = 2 if (_num_parallel_cores() >= 2 and nb >= 2) else 1
    ni = -(-nb // nc)
    nb_full = orig_n // tile                      # fully-valid blocks
    needs_mask = (nc * ni * tile) != orig_n

    kernel = functools.partial(
        _focal_kernel, alpha=float(alpha), gamma=float(gamma),
        binary_labels=binary_labels, orig_n=orig_n, row_blk=row_blk,
        ni=ni, nb_full=nb_full, needs_mask=needs_mask)

    def in_map(c, i):
        # Clamp the (at most one) phantom trailing block of an uneven 2-way
        # core split onto the last real block; the kernel masks it to zero.
        return (jnp.minimum(c * ni + i, nb - 1), 0)

    n_proc = rows * _LANES
    cost = pl.CostEstimate(
        flops=25 * n_proc,
        transcendentals=2 * n_proc,
        bytes_accessed=(x2.size * x2.dtype.itemsize
                        + y2.size * y2.dtype.itemsize
                        + nc * _ACC_ROWS * _LANES * 4))

    out = pl.pallas_call(
        kernel,
        out_shape=jax.ShapeDtypeStruct((nc * _ACC_ROWS, _LANES), jnp.float32),
        grid_spec=pltpu.PrefetchScalarGridSpec(
            num_scalar_prefetch=0,
            grid=(nc, ni),
            in_specs=[pl.BlockSpec((row_blk, _LANES), in_map),
                      pl.BlockSpec((row_blk, _LANES), in_map)],
            out_specs=pl.BlockSpec((_ACC_ROWS, _LANES), lambda c, i: (c, 0)),
        ),
        compiler_params=pltpu.CompilerParams(
            # NOTE(v7x): if a trace shows one idle TensorCore, switch axis 0 to
            # pltpu.CORE_PARALLEL; plain "parallel" is kept here for portability.
            dimension_semantics=("parallel", "arbitrary"),
            vmem_limit_bytes=32 * 1024 * 1024),
        cost_estimate=cost,
    )(x2, y2)

    # Tiny final cross-lane reduction of the per-core (8,128) partial sums.
    return jnp.sum(out) * scale


if __name__ == "__main__":
    key = jax.random.PRNGKey(0)
    k1, k2, k3, k4, k5, k6, k7 = jax.random.split(key, 7)

    # Small NCHW example (matches the PyTorch usage pattern): N=2, C=4, H=W=16.
    logits = jax.random.normal(k1, (2, 4, 16, 16), dtype=jnp.float32)
    label = jax.random.randint(k2, (2, 4, 16, 16), 0, 2, dtype=jnp.int32)
    loss = jax.block_until_ready(focal_loss_v1(logits, label, 0.25, 2.0, "mean"))
    ref = _focal_loss_ref(logits, label, 0.25, 2.0, "mean")
    assert jnp.allclose(loss, ref, rtol=2e-3, atol=1e-6), (loss, ref)

    loss_s = jax.block_until_ready(focal_loss_v1(logits, label, 0.25, 2.0, "sum"))
    ref_s = _focal_loss_ref(logits, label, 0.25, 2.0, "sum")
    assert jnp.allclose(loss_s, ref_s, rtol=2e-3, atol=1e-4), (loss_s, ref_s)

    # Soft (float) labels: exercises the non-binary label path.
    soft = jax.random.uniform(k3, (2, 4, 16, 16), dtype=jnp.float32)
    loss_f = jax.block_until_ready(focal_loss_v1(logits, soft, 0.25, 2.0, "mean"))
    ref_f = _focal_loss_ref(logits, soft, 0.25, 2.0, "mean")
    assert jnp.allclose(loss_f, ref_f, rtol=2e-3, atol=1e-6), (loss_f, ref_f)

    # Odd total size (not a multiple of 128 lanes): exercises the lane-pad path
    # plus the ragged / fully-masked block branches at small scale.
    logits_o = jax.random.normal(k4, (3, 5, 7, 11), dtype=jnp.float32)
    label_o = jax.random.randint(k5, (3, 5, 7, 11), 0, 2, dtype=jnp.int32)
    loss_o = jax.block_until_ready(focal_loss_v1(logits_o, label_o, 0.25, 2.0, "mean"))
    ref_o = _focal_loss_ref(logits_o, label_o, 0.25, 2.0, "mean")
    assert jnp.allclose(loss_o, ref_o, rtol=2e-3, atol=1e-6), (loss_o, ref_o)

    # Multi-block grid with a ragged (block-level) tail and NO wrapper-side
    # padding copy (total size is a multiple of 128).
    logits_b = jax.random.normal(k6, (2, 19, 136, 128), dtype=jnp.float32)
    label_b = jax.random.randint(k7, (2, 19, 136, 128), 0, 2, dtype=jnp.int32)
    loss_b = jax.block_until_ready(focal_loss_v1(logits_b, label_b, 0.25, 2.0, "mean"))
    ref_b = _focal_loss_ref(logits_b, label_b, 0.25, 2.0, "mean")
    assert jnp.allclose(loss_b, ref_b, rtol=2e-3, atol=1e-6), (loss_b, ref_b)

    print("KERNEL_OK")
</pallas_src>

<mosaic_0001>
module attributes {stable_mosaic.version = 11 : i64} {
  func.func @_focal_kernel(%arg0: i32, %arg1: i32, %arg2: memref<16x128xf32, #tpu.memory_space<vmem>>, %arg3: memref<16x128xi32, #tpu.memory_space<vmem>>, %arg4: memref<8x128xf32, #tpu.memory_space<vmem>>) attributes {dimension_semantics = [#tpu.dimension_semantics<parallel>, #tpu.dimension_semantics<arbitrary>], iteration_bounds = array<i64: 1, 1>, scalar_prefetch = 0 : i64, scratch_operands = 0 : i64, tpu.core_type = #tpu.core_type<tc>, window_params = [{transform_indices = @transform_0, window_bounds = array<i64: 16, 128>}, {transform_indices = @transform_1, window_bounds = array<i64: 16, 128>}, {transform_indices = @transform_2, window_bounds = array<i64: 8, 128>}]} {
    %c0_i32 = arith.constant 0 : i32
    %0 = arith.cmpi eq, %arg1, %c0_i32 : i32
    %1 = arith.extui %0 : i1 to i32
    %c0_i32_0 = arith.constant 0 : i32
    %2 = arith.cmpi ne, %1, %c0_i32_0 : i32
    scf.if %2 {
      %cst_18 = arith.constant 0.000000e+00 : f32
      %41 = vector.broadcast %cst_18 : f32 to vector<8x128xf32>
      %c0_19 = arith.constant 0 : index
      %c0_20 = arith.constant 0 : index
      %42 = vector.load %arg4[%c0_19, %c0_20] : memref<8x128xf32, #tpu.memory_space<vmem>>, vector<8x128xf32>
      tpu.vector_store %arg4[%c0_19, %c0_20], %41 {strides = array<i32>} : memref<8x128xf32, #tpu.memory_space<vmem>>, vector<8x128xf32>,
    } else {
    }
    %c0 = arith.constant 0 : index
    %c0_1 = arith.constant 0 : index
    %3 = vector.load %arg2[%c0, %c0_1] : memref<16x128xf32, #tpu.memory_space<vmem>>, vector<16x128xf32>
    %c0_2 = arith.constant 0 : index
    %c0_3 = arith.constant 0 : index
    %4 = vector.load %arg3[%c0_2, %c0_3] : memref<16x128xi32, #tpu.memory_space<vmem>>, vector<16x128xi32>
    %5 = math.absf %3 : vector<16x128xf32>
    %cst = arith.constant 0.000000e+00 : f32
    %6 = vector.broadcast %cst : f32 to vector<16x128xf32>
    %7 = arith.subf %6, %5 : vector<16x128xf32>
    %8 = math.exp %7 : vector<16x128xf32>
    %cst_4 = arith.constant 1.000000e+00 : f32
    %9 = vector.broadcast %cst_4 : f32 to vector<16x128xf32>
    %10 = arith.addf %9, %8 : vector<16x128xf32>
    %11 = tpu.reciprocal %10 {approx = true} : vector<16x128xf32> -> vector<16x128xf32>
    %cst_5 = arith.constant 0.000000e+00 : f32
    %12 = vector.broadcast %cst_5 : f32 to vector<16x128xf32>
    %13 = arith.cmpf oge, %3, %12 : vector<16x128xf32>
    %14 = arith.mulf %8, %11 : vector<16x128xf32>
    %15 = arith.select %13, %11, %14 : vector<16x128xi1>, vector<16x128xf32>
    %16 = math.log %10 : vector<16x128xf32>
    %c0_i32_6 = arith.constant 0 : i32
    %17 = vector.broadcast %c0_i32_6 : i32 to vector<16x128xi32>
    %18 = arith.cmpi ne, %4, %17 : vector<16x128xi32>
    %cst_7 = arith.constant 0.000000e+00 : f32
    %19 = vector.broadcast %cst_7 : f32 to vector<16x128xf32>
    %20 = arith.maximumf %3, %19 : vector<16x128xf32>
    %cst_8 = arith.constant 0.000000e+00 : f32
    %21 = vector.broadcast %cst_8 : f32 to vector<16x128xf32>
    %22 = arith.select %18, %3, %21 : vector<16x128xi1>, vector<16x128xf32>
    %23 = arith.subf %20, %22 : vector<16x128xf32>
    %24 = arith.addf %23, %16 : vector<16x128xf32>
    %cst_9 = arith.constant 1.000000e+00 : f32
    %25 = vector.broadcast %cst_9 : f32 to vector<16x128xf32>
    %26 = arith.subf %25, %15 : vector<16x128xf32>
    %27 = arith.select %18, %15, %26 : vector<16x128xi1>, vector<16x128xf32>
    %cst_10 = arith.constant 2.500000e-01 : f32
    %cst_11 = arith.constant 7.500000e-01 : f32
    %28 = vector.broadcast %cst_10 : f32 to vector<16x128xf32>
    %29 = vector.broadcast %cst_11 : f32 to vector<16x128xf32>
    %30 = arith.select %18, %28, %29 : vector<16x128xi1>, vector<16x128xf32>
    %cst_12 = arith.constant 1.000000e+00 : f32
    %31 = vector.broadcast %cst_12 : f32 to vector<16x128xf32>
    %32 = arith.subf %31, %27 : vector<16x128xf32>
    %33 = arith.mulf %32, %32 : vector<16x128xf32>
    %34 = arith.mulf %30, %33 : vector<16x128xf32>
    %35 = arith.mulf %34, %24 : vector<16x128xf32>
    %c0_13 = arith.constant 0 : index
    %c0_14 = arith.constant 0 : index
    %36 = vector.load %arg4[%c0_13, %c0_14] : memref<8x128xf32, #tpu.memory_space<vmem>>, vector<8x128xf32>
    %37 = vector.shape_cast %35 : vector<16x128xf32> to vector<2x8x128xf32>
    %cst_15 = arith.constant dense<0.000000e+00> : vector<8x128xf32>
    %38 = vector.multi_reduction <add>, %37, %cst_15 [0] : vector<2x8x128xf32> to vector<8x128xf32>
    %39 = arith.addf %36, %38 : vector<8x128xf32>
    %c0_16 = arith.constant 0 : index
    %c0_17 = arith.constant 0 : index
    %40 = vector.load %arg4[%c0_16, %c0_17] : memref<8x128xf32, #tpu.memory_space<vmem>>, vector<8x128xf32>
    tpu.vector_store %arg4[%c0_16, %c0_17], %39 {strides = array<i32>} : memref<8x128xf32, #tpu.memory_space<vmem>>, vector<8x128xf32>,
    return
  }
  func.func @transform_0(%arg0: i32, %arg1: i32) -> (i32, i32) {
    %c1_i32 = arith.constant 1 : i32
    %0 = arith.muli %arg0, %c1_i32 : i32
    %1 = arith.addi %0, %arg1 : i32
    %c0_i32 = arith.constant 0 : i32
    %2 = arith.minsi %1, %c0_i32 : i32
    %c0_i32_0 = arith.constant 0 : i32
    %c0_i32_1 = arith.constant 0 : i32
    return %2, %c0_i32_0 : i32, i32
  }
  func.func @transform_1(%arg0: i32, %arg1: i32) -> (i32, i32) {
    %c1_i32 = arith.constant 1 : i32
    %0 = arith.muli %arg0, %c1_i32 : i32
    %1 = arith.addi %0, %arg1 : i32
    %c0_i32 = arith.constant 0 : i32
    %2 = arith.minsi %1, %c0_i32 : i32
    %c0_i32_0 = arith.constant 0 : i32
    %c0_i32_1 = arith.constant 0 : i32
    return %2, %c0_i32_0 : i32, i32
  }
  func.func @transform_2(%arg0: i32, %arg1: i32) -> (i32, i32) {
    %c0_i32 = arith.constant 0 : i32
    %c0_i32_0 = arith.constant 0 : i32
    return %arg0, %c0_i32 : i32, i32
  }
}

</mosaic_0001>

<bundles_post_ra>
// kernel: tpu_custom_call.1
= control target key start
LH: loop header
LB: loop body
LE: loop exit
PB: predicated region body
PF: predicated region fallthrough
CT: control target
= control target key end

     0   :  { %7 = vsyncpa [#allocation3], 0  ;;  %s293_s0 = inlined_call_operand.hbm [shape: f32[16,128], index: 0, kind: input, shape index: {}]   ;;  %s294_s1 = inlined_call_operand.hbm [shape: s32[16,128], index: 1, kind: input, shape index: {}]   ;;  %s295_s2 = inlined_call_operand.hbm [shape: f32[8,128], index: 2, kind: output, shape index: {}]  }
   0x1   :  { %8 = vsyncpa [#allocation6], 0 }
   0x2   :  { %9 = vsyncpa [#allocation4], 0  ;;  %s230_s9 = smov [#allocation2]   ;;  %s158_s13 = scalar_lea.hbm %s293_s0, 256 }
   0x3   :  { %s21_s10 = sshll.u32 %s230_s9, 4  ;;  %p159_p0 = scmp.ne.s32.totalorder %s293_s0, %s158_s13  ;;  %s22_s10 = int_to_ptr.vmem [resolvable:$true] %s21_s10 }
   0x4   :  { %p162_p1 = scmp.lt.u32.totalorder %s158_s13, %s293_s0 }
   0x6   :  { %p164_p2 = pnand %p162_p1, %p159_p0 }
   0x8   :  { %167 = shalt.err (!%p164_p2)
}
   0x9   :  { %s168_s18 = scalar_lea.vmem %s22_s10, 256  ;;  %p173_p4 = scmp.lt.s32.totalorder %s22_s10, %s22_s10 }
   0xa   :  { %p169_p3 = scmp.ne.s32.totalorder %s22_s10, %s168_s18  ;;  %p174_p5 = scmp.lt.s32.totalorder %s168_s18, %s168_s18 }
   0xc   :  { %p175_p6 = por %p174_p5, %p173_p4 }
   0xe   :  { %p176_p7 = pnand %p175_p6, %p169_p3 }
  0x10   :  { %179 = shalt.err (!%p176_p7)
}
  0x11   :  { %s231_s19 = smov 128   ;;  %s232_s20 = smov 8  }
  0x12   :  { %27 = dma.hbm_to_vmem [thread:$0]  %s293_s0, 256, %s22_s10, [#allocation3], %s231_s19, %s231_s19, %s232_s20  }
  0x13   :  { %s233_s23 = smov [#allocation5]   ;;  %s180_s27 = scalar_lea.hbm %s294_s1, 256 }
  0x14   :  { %s39_s24 = sshll.u32 %s233_s23, 4  ;;  %p181_p8 = scmp.ne.s32.totalorder %s294_s1, %s180_s27  ;;  %s40_s24 = int_to_ptr.vmem [resolvable:$true] %s39_s24 }
  0x15   :  { %p184_p9 = scmp.lt.u32.totalorder %s180_s27, %s294_s1 }
  0x17   :  { %p186_p10 = pnand %p184_p9, %p181_p8 }
  0x19   :  { %189 = shalt.err (!%p186_p10)
}
  0x1a   :  { %s190_s4 = scalar_lea.vmem %s40_s24, 256  ;;  %p195_p12 = scmp.lt.s32.totalorder %s40_s24, %s40_s24 }
  0x1b   :  { %p191_p11 = scmp.ne.s32.totalorder %s40_s24, %s190_s4  ;;  %p196_p13 = scmp.lt.s32.totalorder %s190_s4, %s190_s4 }
  0x1d   :  { %p197_p0 = por %p196_p13, %p195_p12 }
  0x1f   :  { %p198_p1 = pnand %p197_p0, %p191_p11 }
  0x21   :  { %201 = shalt.err (!%p198_p1)
}
  0x22   :  { %45 = dma.hbm_to_vmem [thread:$0]  %s294_s1, 256, %s40_s24, [#allocation6], %s231_s19, %s231_s19, %s232_s20  }
  0x23   :  { %224 = dma.done.wait [#allocation3], 256  }
  0x24   :  { %225 = vsyncadd [#allocation3], 4294967040 }
  0x25   :  { %226 = dma.done.wait [#allocation6], 256  }
  0x26   :  { %227 = vsyncadd [#allocation6], 4294967040  ;;  %v65_v0 = vld [vmem:[#allocation2] sm:$0xff]  ;;  %v66_v1 = vld [vmem:[#allocation2 + $0x8] sm:$0xff]  ;;  %v234_v35 = vmov 0.75   ;;  %s235_s1 = smov [#allocation7]  }
  0x27   :  { %v69_v2 = vand.u32 2147483647, %v65_v0  ;;  %v70_v3 = vand.u32 2147483647, %v66_v1  ;;  %v67_v12 = vld [vmem:[#allocation5] sm:$0xff]  ;;  %v68_v13 = vld [vmem:[#allocation5 + $0x8] sm:$0xff] }
  0x28   :  { %vm81_vm0 = vcmp.ge.f32.partialorder %v65_v0, 0.0  ;;  %vm82_vm1 = vcmp.ge.f32.partialorder %v66_v1, 0.0  ;;  %vm91_vm2 = vcmp.ne.s32.totalorder %v67_v12, 0  ;;  %v93_v17 = vmax.f32 %v65_v0, 0.0  ;;  %s125_s6 = sshll.u32 %s235_s1, 4  ;;  %s126_s6 = int_to_ptr.vmem [resolvable:$true] %s125_s6 }
  0x29   :  { %v71_v4 = vsub.f32 0.0, %v69_v2  ;;  %v72_v5 = vsub.f32 0.0, %v70_v3  ;;  %vm92_vm3 = vcmp.ne.s32.totalorder %v68_v13, 0  ;;  %v94_v20 = vmax.f32 %v66_v1, 0.0  ;;  %s202_s7 = scalar_lea.vmem %s126_s6, 128  ;;  %p207_p3 = scmp.lt.s32.totalorder %s126_s6, %s126_s6 }
  0x2a   :  { %v95_v21 = vsel %vm91_vm2, %v65_v0, 0.0  ;;  %v96_v24 = vsel %vm92_vm3, %v66_v1, 0.0  ;;  %v105_v36 = vsel %vm91_vm2, 0.25, %v234_v35  ;;  %v106_v39 = vsel %vm92_vm3, 0.25, %v234_v35  ;;  %p203_p2 = scmp.ne.s32.totalorder %s126_s6, %s202_s7  ;;  %p208_p4 = scmp.lt.s32.totalorder %s202_s7, %s202_s7 }
  0x2b   :  { %v73_v6 = vmul.f32 1.442695, %v71_v4  ;;  %v75_v7 = vmul.f32 1.442695, %v72_v5  ;;  %v97_v28 = vsub.f32 %v93_v17, %v95_v21  ;;  %v98_v31 = vsub.f32 %v94_v20, %v96_v24 }
  0x2c   :  { %p209_p5 = por %p208_p4, %p207_p3 }
  0x2d   :  { %146 = vpow2.f32 %v73_v6 }
  0x2e   :  { %148 = vpow2.f32 %v75_v7  ;;  %p210_p6 = pnand %p209_p5, %p203_p2 }
  0x37   :  { %v147_v8 = vpop.eup %146 }
  0x38   :  { %v149_v9 = vpop.eup %148  ;;  %v77_v10 = vadd.f32 1.0, %v147_v8 }
  0x39   :  { %v78_v11 = vadd.f32 1.0, %v149_v9 }
  0x3a   :  { %150 = vrcp.f32 %v77_v10 }
  0x3b   :  { %152 = vrcp.f32 %v78_v11 }
  0x3c   :  { %154 = vlog2.f32 %v77_v10 }
  0x3d   :  { %156 = vlog2.f32 %v78_v11 }
  0x44   :  { %v151_v14 = vpop.eup %150 }
  0x45   :  { %v153_v15 = vpop.eup %152  ;;  %v83_v16 = vmul.f32 %v151_v14, %v147_v8 }
  0x46   :  { %v155_v18 = vpop.eup %154  ;;  %v84_v19 = vmul.f32 %v153_v15, %v149_v9 }
  0x47   :  { %v157_v22 = vpop.eup %156  ;;  %v85_v23 = vsel %vm81_vm0, %v151_v14, %v83_v16  ;;  %v88_v27 = vmul.f32 0.6931472, %v155_v18 }
  0x48   :  { %v86_v25 = vsel %vm82_vm1, %v153_v15, %v84_v19  ;;  %v101_v26 = vsub.f32 1.0, %v85_v23  ;;  %v90_v30 = vmul.f32 0.6931472, %v157_v22 }
  0x49   :  { %v102_v29 = vsub.f32 1.0, %v86_v25  ;;  %v99_v38 = vadd.f32 %v97_v28, %v88_v27 }
  0x4a   :  { %v103_v32 = vsel %vm91_vm2, %v85_v23, %v101_v26  ;;  %v100_v41 = vadd.f32 %v98_v31, %v90_v30 }
  0x4b   :  { %v104_v33 = vsel %vm92_vm3, %v86_v25, %v102_v29  ;;  %v107_v34 = vsub.f32 1.0, %v103_v32 }
  0x4c   :  { %v108_v37 = vsub.f32 1.0, %v104_v33 }
  0x4d   :  { %v109_v40 = vmul.f32 %v107_v34, %v107_v34 }
  0x4e   :  { %v110_v42 = vmul.f32 %v108_v37, %v108_v37 }
  0x4f   :  { %v111_v43 = vmul.f32 %v109_v40, %v105_v36 }
  0x50   :  { %v112_v44 = vmul.f32 %v110_v42, %v106_v39 }
  0x51   :  { %v113_v45 = vmul.f32 %v111_v43, %v99_v38 }
  0x52   :  { %v114_v46 = vmul.f32 %v112_v44, %v100_v41 }
  0x54   :  { %v116_v47 = vadd.f32 %v114_v46, %v113_v45 }
  0x56   :  { %118 = vst [vmem:[#allocation7] sm:$0xff] %v116_v47 }
  0x57   :  { %213 = shalt.err (!%p210_p6)
}
  0x58   :  { %s214_s10 = scalar_lea.hbm %s295_s2, 128 }
  0x59   :  { %p215_p7 = scmp.ne.s32.totalorder %s295_s2, %s214_s10  ;;  %p218_p8 = scmp.lt.u32.totalorder %s214_s10, %s295_s2 }
  0x5b   :  { %p220_p9 = pnand %p218_p8, %p215_p7 }
  0x5d   :  { %223 = shalt.err (!%p220_p9)
}
  0x5e   :  { %128 = dma.vmem_to_hbm [thread:$0]  %s126_s6, 128, %s295_s2, [#allocation4]  }
  0x5f   :  { %228 = dma.done.wait [#allocation4], 128  }
  0x60   :  { %229 = vsyncadd [#allocation4], 4294967168 }
  0x61   :  { %132 = vsyncpa [#allocation3], 1 }
  0x62   :  { %133 = vsyncpa [#allocation6], 1 }
  0x63   :  { %134 = vsyncpa [#allocation4], 1 }

</bundles_post_ra>
